<compile_context>
chip_gen: v5e
topology: v5e:2x2
jax: 0.10.0
libtpu: 0.0.40
codegen_flags: <defaults>
</compile_context>

<pallas_src>
import functools

import jax
import jax.numpy as jnp
from jax import lax
from jax.experimental import pallas as pl
from jax.experimental.pallas import tpu as pltpu

EPS = 1e-5                           # default eps of nn.BatchNorm2d / nn.InstanceNorm2d
_MAX_BLOCK_BYTES = 2 * 1024 * 1024   # per-block cap so the 2-deep pipeline fits easily


def _ibnorm_block_kernel(x_ref, gamma_ref, beta_ref, o_ref, *, bn_blocks, eps):
    """Aligned path. Grid is (C // Cb,); block i covers channels [i*Cb, (i+1)*Cb).

    Blocks with i <  bn_blocks are entirely BatchNorm channels.
    Blocks with i >= bn_blocks are entirely InstanceNorm channels.
    x_ref/o_ref: (N, Cb, HW); gamma_ref/beta_ref: (1, Cb, 1).
    """
    i = pl.program_id(0)
    x = x_ref[...].astype(jnp.float32)                     # (N, Cb, HW)
    n, _, hw = x.shape

    # Per-(sample, channel) partial sums, computed once, reused by either branch.
    s_nc = jnp.sum(x, axis=2, keepdims=True)               # (N, Cb, 1)
    ss_nc = jnp.sum(x * x, axis=2, keepdims=True)          # (N, Cb, 1)

    @pl.when(i < bn_blocks)
    def _bn():                                             # batch stats over (N, HW)
        cnt = float(n * hw)
        mean = jnp.sum(s_nc, axis=0, keepdims=True) / cnt            # (1, Cb, 1)
        ex2 = jnp.sum(ss_nc, axis=0, keepdims=True) / cnt
        var = jnp.maximum(ex2 - mean * mean, 0.0)
        scale = gamma_ref[...].astype(jnp.float32) * lax.rsqrt(var + eps)
        shift = beta_ref[...].astype(jnp.float32) - mean * scale
        o_ref[...] = (x * scale + shift).astype(o_ref.dtype)

    @pl.when(i >= bn_blocks)
    def _in():                                             # per-sample stats over HW
        cnt = float(hw)
        mean = s_nc / cnt                                             # (N, Cb, 1)
        var = jnp.maximum(ss_nc / cnt - mean * mean, 0.0)
        o_ref[...] = ((x - mean) * lax.rsqrt(var + eps)).astype(o_ref.dtype)


def _ibnorm_mixed_kernel(x_ref, gamma_ref, beta_ref, o_ref, *, bn_c, eps):
    """Fallback path (tiny / awkward channel counts): one block holds all channels.

    The BN/IN split position `bn_c` is static, so each half is processed exactly
    once via static ref slices (no full-tile select, no duplicated work).
    x_ref/o_ref: (N, C, HW); gamma_ref/beta_ref: (1, bn_c, 1).
    """
    # --- BatchNorm half: channels [0, bn_c) ---
    xb = x_ref[:, :bn_c, :].astype(jnp.float32)            # (N, bn_c, HW)
    n, _, hw = xb.shape
    cnt = float(n * hw)
    mean = jnp.sum(jnp.sum(xb, axis=2, keepdims=True), axis=0, keepdims=True) / cnt
    ex2 = jnp.sum(jnp.sum(xb * xb, axis=2, keepdims=True), axis=0, keepdims=True) / cnt
    var = jnp.maximum(ex2 - mean * mean, 0.0)
    scale = gamma_ref[...].astype(jnp.float32) * lax.rsqrt(var + eps)
    shift = beta_ref[...].astype(jnp.float32) - mean * scale
    o_ref[:, :bn_c, :] = (xb * scale + shift).astype(o_ref.dtype)

    # --- InstanceNorm half: channels [bn_c, C) ---
    xi = x_ref[:, bn_c:, :].astype(jnp.float32)            # (N, C - bn_c, HW)
    im = jnp.sum(xi, axis=2, keepdims=True) / float(hw)
    iv = jnp.maximum(jnp.sum(xi * xi, axis=2, keepdims=True) / float(hw) - im * im, 0.0)
    o_ref[:, bn_c:, :] = ((xi - im) * lax.rsqrt(iv + eps)).astype(o_ref.dtype)


def _choose_block_channels(N, C, bn_c, HW, itemsize):
    """Largest channels-per-block Cb such that:
       * Cb is a multiple of 8 (clean sublane tiling for the (Cb, HW) tile),
       * the BN/IN boundary falls on a block edge (Cb | bn_c and Cb | (C - bn_c)),
       * the block stays small enough to double-buffer comfortably in VMEM.
    Returns None when no such Cb exists (tiny channel counts) -> fallback path."""
    in_c = C - bn_c
    best = None
    for cb in range(8, bn_c + 1, 8):
        if bn_c % cb or in_c % cb:
            continue
        if N * cb * HW * max(int(itemsize), 4) > _MAX_BLOCK_BYTES:
            break  # blocks only get bigger from here
        best = cb
    return best


def ibnorm(x_nchw, gamma, beta):
    """IBNorm forward. x_nchw: (N, C, H, W). gamma/beta: (C//2,) BN affine params."""
    N, C, H, W = x_nchw.shape
    bn_c = C // 2
    assert bn_c >= 1, "IBNorm needs at least 2 channels"
    assert gamma.shape == (bn_c,) and beta.shape == (bn_c,)
    HW = H * W

    # Free reshapes only (NCHW is contiguous) — no XLA transposes.
    x = x_nchw.reshape(N, C, HW)
    g = gamma.astype(jnp.float32).reshape(1, bn_c, 1)
    b = beta.astype(jnp.float32).reshape(1, bn_c, 1)

    cparams = pltpu.CompilerParams(
        dimension_semantics=("parallel",),
        vmem_limit_bytes=32 * 1024 * 1024,
    )

    cb = _choose_block_channels(N, C, bn_c, HW, jnp.dtype(x_nchw.dtype).itemsize)
    if cb is not None:
        # Aligned path: every block is entirely BN or entirely IN -> pl.when gating.
        bn_blocks = bn_c // cb
        if bn_blocks == 1:
            gb_map = lambda i: (0, 0, 0)
        else:
            gb_map = lambda i: (0, i % bn_blocks, 0)   # IN blocks map to a dummy (unused) slice
        out = pl.pallas_call(
            functools.partial(_ibnorm_block_kernel, bn_blocks=bn_blocks, eps=EPS),
            out_shape=jax.ShapeDtypeStruct((N, C, HW), x_nchw.dtype),
            grid=(C // cb,),
            in_specs=[
                pl.BlockSpec((N, cb, HW), lambda i: (0, i, 0)),   # x
                pl.BlockSpec((1, cb, 1), gb_map),                 # gamma
                pl.BlockSpec((1, cb, 1), gb_map),                 # beta
            ],
            out_specs=pl.BlockSpec((N, cb, HW), lambda i: (0, i, 0)),
            compiler_params=cparams,
        )(x, g, b)
    else:
        # Fallback: whole tensor in one block; BN/IN split handled statically in-kernel.
        # TODO(synk): for very large activations that exceed VMEM in this fallback,
        # add a spatial grid axis with sum/sumsq scratch accumulation + a second
        # normalize pass (not needed for small-channel-count shapes like the demo).
        out = pl.pallas_call(
            functools.partial(_ibnorm_mixed_kernel, bn_c=bn_c, eps=EPS),
            out_shape=jax.ShapeDtypeStruct((N, C, HW), x_nchw.dtype),
            grid=(1,),
            in_specs=[
                pl.BlockSpec((N, C, HW), lambda i: (0, 0, 0)),
                pl.BlockSpec((1, bn_c, 1), lambda i: (0, 0, 0)),
                pl.BlockSpec((1, bn_c, 1), lambda i: (0, 0, 0)),
            ],
            out_specs=pl.BlockSpec((N, C, HW), lambda i: (0, 0, 0)),
            compiler_params=cparams,
        )(x, g, b)

    return out.reshape(N, C, H, W)


def ibnorm_ref(x, gamma, beta):
    """Pure-JAX reference matching the PyTorch module's forward (training mode)."""
    N, C, H, W = x.shape
    bn_c = C // 2
    xb = x[:, :bn_c].astype(jnp.float32)
    m = xb.mean(axis=(0, 2, 3), keepdims=True)
    v = ((xb - m) ** 2).mean(axis=(0, 2, 3), keepdims=True)
    bn = (xb - m) / jnp.sqrt(v + EPS) * gamma[None, :, None, None] \
         + beta[None, :, None, None]
    xi = x[:, bn_c:].astype(jnp.float32)
    im = xi.mean(axis=(2, 3), keepdims=True)
    iv = ((xi - im) ** 2).mean(axis=(2, 3), keepdims=True)
    inx = (xi - im) / jnp.sqrt(iv + EPS)
    return jnp.concatenate([bn, inx], axis=1).astype(x.dtype)


if __name__ == "__main__":
    key = jax.random.PRNGKey(0)
    k1, k2, k3, k4 = jax.random.split(key, 4)

    # --- Test 1: module-sized demo (C=4 -> fallback single-block path) ---
    N, C, H, W = 2, 4, 16, 16
    x = jax.random.normal(k1, (N, C, H, W), dtype=jnp.float32) * 3.0 + 1.5
    gamma = jnp.ones((C // 2,), jnp.float32)   # nn.BatchNorm2d default init (weight=1)
    beta = jnp.zeros((C // 2,), jnp.float32)   # nn.BatchNorm2d default init (bias=0)
    out = jax.block_until_ready(ibnorm(x, gamma, beta))
    ref = jax.block_until_ready(ibnorm_ref(x, gamma, beta))
    assert out.shape == (N, C, H, W)
    assert jnp.allclose(out, ref, atol=1e-4, rtol=1e-4), \
        f"max err {jnp.max(jnp.abs(out - ref))}"

    # --- Test 2: larger channel count exercises the aligned, pl.when-gated path
    #     (grid of 2 channel blocks -> both v7x TensorCores get work) ---
    N2, C2, H2, W2 = 2, 32, 16, 16
    x2 = jax.random.normal(k2, (N2, C2, H2, W2), dtype=jnp.float32) * 2.0 + 0.5
    gamma2 = 0.5 + jax.random.uniform(k3, (C2 // 2,), jnp.float32)
    beta2 = jax.random.normal(k4, (C2 // 2,), jnp.float32)
    out2 = jax.block_until_ready(ibnorm(x2, gamma2, beta2))
    ref2 = jax.block_until_ready(ibnorm_ref(x2, gamma2, beta2))
    assert out2.shape == (N2, C2, H2, W2)
    assert jnp.allclose(out2, ref2, atol=1e-4, rtol=1e-4), \
        f"max err {jnp.max(jnp.abs(out2 - ref2))}"

    print("KERNEL_OK")
</pallas_src>

<mosaic_0001>
module attributes {stable_mosaic.version = 11 : i64} {
  func.func @_ibnorm_mixed_kernel(%arg0: i32, %arg1: memref<2x4x256xf32, #tpu.memory_space<vmem>>, %arg2: memref<1x2x1xf32, #tpu.memory_space<vmem>>, %arg3: memref<1x2x1xf32, #tpu.memory_space<vmem>>, %arg4: memref<2x4x256xf32, #tpu.memory_space<vmem>>) attributes {dimension_semantics = [#tpu.dimension_semantics<parallel>], iteration_bounds = array<i64: 1>, scalar_prefetch = 0 : i64, scratch_operands = 0 : i64, tpu.core_type = #tpu.core_type<tc>, window_params = [{pipeline_mode = #tpu.pipeline_mode<synchronous>, transform_indices = @transform_0, window_bounds = array<i64: 2, 4, 256>}, {pipeline_mode = #tpu.pipeline_mode<synchronous>, transform_indices = @transform_1, window_bounds = array<i64: 1, 2, 1>}, {pipeline_mode = #tpu.pipeline_mode<synchronous>, transform_indices = @transform_2, window_bounds = array<i64: 1, 2, 1>}, {pipeline_mode = #tpu.pipeline_mode<synchronous>, transform_indices = @transform_3, window_bounds = array<i64: 2, 4, 256>}]} {
    %c0 = arith.constant 0 : index
    %c0_0 = arith.constant 0 : index
    %c0_1 = arith.constant 0 : index
    %0 = vector.load %arg1[%c0, %c0_0, %c0_1] : memref<2x4x256xf32, #tpu.memory_space<vmem>>, vector<2x2x256xf32>
    %cst = arith.constant dense<0.000000e+00> : vector<2x2xf32>
    %1 = vector.multi_reduction <add>, %0, %cst [2] : vector<2x2x256xf32> to vector<2x2xf32>
    %2 = vector.shape_cast %1 : vector<2x2xf32> to vector<2x2x1xf32>
    %cst_2 = arith.constant dense<0.000000e+00> : vector<2x1xf32>
    %3 = vector.multi_reduction <add>, %2, %cst_2 [0] : vector<2x2x1xf32> to vector<2x1xf32>
    %4 = vector.shape_cast %3 : vector<2x1xf32> to vector<1x2x1xf32>
    %cst_3 = arith.constant 5.120000e+02 : f32
    %5 = vector.broadcast %cst_3 : f32 to vector<1x2x1xf32>
    %6 = arith.divf %4, %5 : vector<1x2x1xf32>
    %7 = arith.mulf %0, %0 : vector<2x2x256xf32>
    %cst_4 = arith.constant dense<0.000000e+00> : vector<2x2xf32>
    %8 = vector.multi_reduction <add>, %7, %cst_4 [2] : vector<2x2x256xf32> to vector<2x2xf32>
    %9 = vector.shape_cast %8 : vector<2x2xf32> to vector<2x2x1xf32>
    %cst_5 = arith.constant dense<0.000000e+00> : vector<2x1xf32>
    %10 = vector.multi_reduction <add>, %9, %cst_5 [0] : vector<2x2x1xf32> to vector<2x1xf32>
    %11 = vector.shape_cast %10 : vector<2x1xf32> to vector<1x2x1xf32>
    %cst_6 = arith.constant 5.120000e+02 : f32
    %12 = vector.broadcast %cst_6 : f32 to vector<1x2x1xf32>
    %13 = arith.divf %11, %12 : vector<1x2x1xf32>
    %14 = arith.mulf %6, %6 : vector<1x2x1xf32>
    %15 = arith.subf %13, %14 : vector<1x2x1xf32>
    %cst_7 = arith.constant 0.000000e+00 : f32
    %16 = vector.broadcast %cst_7 : f32 to vector<1x2x1xf32>
    %17 = arith.maximumf %15, %16 : vector<1x2x1xf32>
    %c0_8 = arith.constant 0 : index
    %c0_9 = arith.constant 0 : index
    %c0_10 = arith.constant 0 : index
    %18 = vector.load %arg2[%c0_8, %c0_9, %c0_10] : memref<1x2x1xf32, #tpu.memory_space<vmem>>, vector<1x2x1xf32>
    %cst_11 = arith.constant 9.99999974E-6 : f32
    %19 = vector.broadcast %cst_11 : f32 to vector<1x2x1xf32>
    %20 = arith.addf %17, %19 : vector<1x2x1xf32>
    %21 = math.rsqrt %20 : vector<1x2x1xf32>
    %22 = arith.mulf %18, %21 : vector<1x2x1xf32>
    %c0_12 = arith.constant 0 : index
    %c0_13 = arith.constant 0 : index
    %c0_14 = arith.constant 0 : index
    %23 = vector.load %arg3[%c0_12, %c0_13, %c0_14] : memref<1x2x1xf32, #tpu.memory_space<vmem>>, vector<1x2x1xf32>
    %24 = arith.mulf %6, %22 : vector<1x2x1xf32>
    %25 = arith.subf %23, %24 : vector<1x2x1xf32>
    %26 = vector.broadcast %22 : vector<1x2x1xf32> to vector<2x2x256xf32>
    %27 = arith.mulf %0, %26 : vector<2x2x256xf32>
    %28 = vector.broadcast %25 : vector<1x2x1xf32> to vector<2x2x256xf32>
    %29 = arith.addf %27, %28 : vector<2x2x256xf32>
    %c0_15 = arith.constant 0 : index
    %c0_16 = arith.constant 0 : index
    %c0_17 = arith.constant 0 : index
    %30 = vector.load %arg4[%c0_15, %c0_16, %c0_17] : memref<2x4x256xf32, #tpu.memory_space<vmem>>, vector<2x2x256xf32>
    tpu.vector_store %arg4[%c0_15, %c0_16, %c0_17], %29 {strides = array<i32>} : memref<2x4x256xf32, #tpu.memory_space<vmem>>, vector<2x2x256xf32>,
    %c0_18 = arith.constant 0 : index
    %c2 = arith.constant 2 : index
    %c0_19 = arith.constant 0 : index
    %31 = vector.load %arg1[%c0_18, %c2, %c0_19] : memref<2x4x256xf32, #tpu.memory_space<vmem>>, vector<2x2x256xf32>
    %cst_20 = arith.constant dense<0.000000e+00> : vector<2x2xf32>
    %32 = vector.multi_reduction <add>, %31, %cst_20 [2] : vector<2x2x256xf32> to vector<2x2xf32>
    %33 = vector.shape_cast %32 : vector<2x2xf32> to vector<2x2x1xf32>
    %cst_21 = arith.constant 2.560000e+02 : f32
    %34 = vector.broadcast %cst_21 : f32 to vector<2x2x1xf32>
    %35 = arith.divf %33, %34 : vector<2x2x1xf32>
    %36 = arith.mulf %31, %31 : vector<2x2x256xf32>
    %cst_22 = arith.constant dense<0.000000e+00> : vector<2x2xf32>
    %37 = vector.multi_reduction <add>, %36, %cst_22 [2] : vector<2x2x256xf32> to vector<2x2xf32>
    %38 = vector.shape_cast %37 : vector<2x2xf32> to vector<2x2x1xf32>
    %cst_23 = arith.constant 2.560000e+02 : f32
    %39 = vector.broadcast %cst_23 : f32 to vector<2x2x1xf32>
    %40 = arith.divf %38, %39 : vector<2x2x1xf32>
    %41 = arith.mulf %35, %35 : vector<2x2x1xf32>
    %42 = arith.subf %40, %41 : vector<2x2x1xf32>
    %cst_24 = arith.constant 0.000000e+00 : f32
    %43 = vector.broadcast %cst_24 : f32 to vector<2x2x1xf32>
    %44 = arith.maximumf %42, %43 : vector<2x2x1xf32>
    %45 = vector.broadcast %35 : vector<2x2x1xf32> to vector<2x2x256xf32>
    %46 = arith.subf %31, %45 : vector<2x2x256xf32>
    %cst_25 = arith.constant 9.99999974E-6 : f32
    %47 = vector.broadcast %cst_25 : f32 to vector<2x2x1xf32>
    %48 = arith.addf %44, %47 : vector<2x2x1xf32>
    %49 = math.rsqrt %48 : vector<2x2x1xf32>
    %50 = vector.broadcast %49 : vector<2x2x1xf32> to vector<2x2x256xf32>
    %51 = arith.mulf %46, %50 : vector<2x2x256xf32>
    %c0_26 = arith.constant 0 : index
    %c2_27 = arith.constant 2 : index
    %c0_28 = arith.constant 0 : index
    %52 = vector.load %arg4[%c0_26, %c2_27, %c0_28] : memref<2x4x256xf32, #tpu.memory_space<vmem>>, vector<2x2x256xf32>
    tpu.vector_store %arg4[%c0_26, %c2_27, %c0_28], %51 {strides = array<i32>} : memref<2x4x256xf32, #tpu.memory_space<vmem>>, vector<2x2x256xf32>,
    return
  }
  func.func @transform_0(%arg0: i32) -> (i32, i32, i32) {
    %c0_i32 = arith.constant 0 : i32
    %c0_i32_0 = arith.constant 0 : i32
    %c0_i32_1 = arith.constant 0 : i32
    %c0_i32_2 = arith.constant 0 : i32
    return %c0_i32, %c0_i32_0, %c0_i32_1 : i32, i32, i32
  }
  func.func @transform_1(%arg0: i32) -> (i32, i32, i32) {
    %c0_i32 = arith.constant 0 : i32
    %c0_i32_0 = arith.constant 0 : i32
    %c0_i32_1 = arith.constant 0 : i32
    %c0_i32_2 = arith.constant 0 : i32
    return %c0_i32, %c0_i32_0, %c0_i32_1 : i32, i32, i32
  }
  func.func @transform_2(%arg0: i32) -> (i32, i32, i32) {
    %c0_i32 = arith.constant 0 : i32
    %c0_i32_0 = arith.constant 0 : i32
    %c0_i32_1 = arith.constant 0 : i32
    %c0_i32_2 = arith.constant 0 : i32
    return %c0_i32, %c0_i32_0, %c0_i32_1 : i32, i32, i32
  }
  func.func @transform_3(%arg0: i32) -> (i32, i32, i32) {
    %c0_i32 = arith.constant 0 : i32
    %c0_i32_0 = arith.constant 0 : i32
    %c0_i32_1 = arith.constant 0 : i32
    %c0_i32_2 = arith.constant 0 : i32
    return %c0_i32, %c0_i32_0, %c0_i32_1 : i32, i32, i32
  }
}

</mosaic_0001>

<bundles_post_ra>
// kernel: tpu_custom_call.1
= control target key start
LH: loop header
LB: loop body
LE: loop exit
PB: predicated region body
PF: predicated region fallthrough
CT: control target
= control target key end

     0   :  { %8 = vsyncpa [#allocation3], 0  ;;  %s441_s0 = inlined_call_operand.hbm [shape: f32[2,4,256], index: 0, kind: input, shape index: {}]   ;;  %s442_s1 = inlined_call_operand.vmem [shape: f32[1,2,1], index: 1, kind: input, shape index: {}]   ;;  %s443_s2 = inlined_call_operand.vmem [shape: f32[1,2,1], index: 2, kind: input, shape index: {}]   ;;  %s444_s3 = inlined_call_operand.hbm [shape: f32[2,4,256], index: 3, kind: output, shape index: {}]  }
   0x1   :  { %9 = vsyncpa [#allocation4], 0  ;;  %s14_s14 = sshll.u32 %s441_s0, 4  ;;  %s351_s15 = smov [#allocation2]   ;;  %s15_s14 = int_to_ptr.hbm [resolvable:$true] %s14_s14 }
   0x2   :  { %s16_s16 = sshll.u32 %s351_s15, 4  ;;  %s352_s17 = smov 128   ;;  %s17_s16 = int_to_ptr.vmem [resolvable:$true] %s16_s16 }
   0x3   :  { %s353_s18 = smov 8  }
   0x4   :  { %22 = dma.hbm_to_vmem [thread:$0]  %s15_s14, 256, %s17_s16, [#allocation3], %s352_s17, %s352_s17, %s353_s18  }
   0x5   :  { %347 = dma.done.wait [#allocation3], 256  }
   0x6   :  { %348 = vsyncadd [#allocation3], 4294967040  ;;  %v385_v0 = vld [vmem:[#allocation2] sm:$0x33]  ;;  %v387_v1 = vld [vmem:[#allocation2 + $0x8] sm:$0x33] }
   0x7   :  { %35 = vst [vmem:[#allocation1] ss:$2 sm:$0xff] %v385_v0  ;;  %v68_v2 = vmul.f32 %v385_v0, %v385_v0  ;;  %vm46_vm0 = vcmask 1041408   ;;  %v69_v3 = vmul.f32 %v387_v1, %v387_v1  ;;  %v399_v13 = vld [vmem:[#allocation2] sm:$0xcc]  ;;  %vm155_vm1 = vcmask 1043458  }
   0x8   :  { %39 = vst [vmem:[#allocation1 + $0x10] ss:$2 sm:$0xff] %v387_v1  ;;  %v401_v14 = vld [vmem:[#allocation2 + $0x8] sm:$0xcc]  ;;  %v175_v23 = vmul.f32 %v399_v13, %v399_v13  ;;  %v354_v48 = vmov 512.0   ;;  %v355_v53 = vmov 0  }
   0x9   :  { %v176_v26 = vmul.f32 %v401_v14, %v401_v14  ;;  %289 = vrcp.f32 %v354_v48  ;;  %287 = vset.pattern.permute.xlu2 %v355_v53  ;;  %288 = vset.pattern.permute.xlu0 %v355_v53  ;;  %s266_s24 = sshll.u32 %s444_s3, 4  ;;  %s267_s24 = int_to_ptr.hbm [resolvable:$true] %s266_s24 }
   0xe   :  { %v36_v4 = vld.sshfl [vmem:[#allocation1] sm:$0xff pattern:$0x75316420]  ;;  %v37_v5 = vld.sshfl [vmem:[#allocation1 + $0x8] sm:$0xff pattern:$0x75316420] }
   0xf   :  { %v47_v6 = vsel %vm46_vm0, %v36_v4, 0.0  ;;  %v48_v7 = vsel %vm46_vm0, %v37_v5, 0.0  ;;  %72 = vst [vmem:[#allocation1] ss:$2 sm:$0xff] %v68_v2  ;;  %v290_v49 = vpop.eup %289 }
  0x10   :  { %v49_v8 = vadd.f32 %v48_v7, %v47_v6  ;;  %v40_v9 = vld.sshfl [vmem:[#allocation1 + $0x10] sm:$0xff pattern:$0x75316420]  ;;  %v41_v10 = vld.sshfl [vmem:[#allocation1 + $0x18] sm:$0xff pattern:$0x75316420]  ;;  %vm65_vm2 = vweird.f32 %v290_v49 }
  0x11   :  { %76 = vst [vmem:[#allocation1 + $0x10] ss:$2 sm:$0xff] %v69_v3  ;;  %v52_v11 = vsel %vm46_vm0, %v40_v9, 0.0  ;;  %v53_v12 = vsel %vm46_vm0, %v41_v10, 0.0  ;;  %v61_v50 = vmul.f32 512.0, %v290_v49 }
  0x12   :  { %50 = vadd.xlane.f32.xlu0 %v49_v8  ;;  %v54_v17 = vadd.f32 %v53_v12, %v52_v11  ;;  %v356_v8 = vmov 256.0  }
  0x13   :  { %v62_v52 = vsub.f32 1.0, %v61_v50  ;;  %291 = vrcp.f32 %v356_v8  ;;  %v357_v50 = vmov 839922192  }
  0x15   :  { %v63_v54 = vmul.f32 %v290_v49, %v62_v52 }
  0x16   :  { %v73_v15 = vld.sshfl [vmem:[#allocation1] sm:$0xff pattern:$0x75316420]  ;;  %v74_v16 = vld.sshfl [vmem:[#allocation1 + $0x8] sm:$0xff pattern:$0x75316420] }
  0x17   :  { %v83_v18 = vsel %vm46_vm0, %v73_v15, 0.0  ;;  %v84_v19 = vsel %vm46_vm0, %v74_v16, 0.0  ;;  %144 = vst [vmem:[#allocation1] ss:$2 sm:$0xff] %v399_v13  ;;  %v64_v57 = vadd.f32 %v290_v49, %v63_v54 }
  0x18   :  { %v85_v20 = vadd.f32 %v84_v19, %v83_v18  ;;  %v77_v21 = vld.sshfl [vmem:[#allocation1 + $0x10] sm:$0xff pattern:$0x75316420]  ;;  %v78_v22 = vld.sshfl [vmem:[#allocation1 + $0x18] sm:$0xff pattern:$0x75316420] }
  0x19   :  { %148 = vst [vmem:[#allocation1 + $0x10] ss:$2 sm:$0xff] %v401_v14  ;;  %v88_v24 = vsel %vm46_vm0, %v77_v21, 0.0  ;;  %v89_v25 = vsel %vm46_vm0, %v78_v22, 0.0  ;;  %v66_v61 = vsel %vm65_vm2, %v290_v49, %v64_v57  ;;  %v292_v11 = vpop.eup %291  ;;  %v100_v22 = vld [vmem:[%s442_s1] sm:$0x3] }
  0x1a   :  { %86 = vadd.xlane.f32.xlu1 %v85_v20  ;;  %55 = vadd.xlane.f32.xlu0 %v54_v17  ;;  %v90_v27 = vadd.f32 %v89_v25, %v88_v24  ;;  %v167_v12 = vmul.f32 256.0, %v292_v11  ;;  %vm171_vm6 = vweird.f32 %v292_v11  ;;  %s358_s1 = smov [#allocation5]  }
  0x1c   :  { %v168_v17 = vsub.f32 1.0, %v167_v12 }
  0x1e   :  { %v145_v28 = vld.sshfl [vmem:[#allocation1] sm:$0xff pattern:$0x75316420]  ;;  %v146_v29 = vld.sshfl [vmem:[#allocation1 + $0x8] sm:$0xff pattern:$0x75316420]  ;;  %v169_v20 = vmul.f32 %v292_v11, %v168_v17 }
  0x1f   :  { %v156_v30 = vsel %vm155_vm1, %v145_v28, 0.0  ;;  %v157_v31 = vsel %vm155_vm1, %v146_v29, 0.0  ;;  %179 = vst [vmem:[#allocation1] ss:$2 sm:$0xff] %v175_v23 }
  0x20   :  { %v158_v32 = vadd.f32 %v157_v31, %v156_v30  ;;  %v149_v33 = vld.sshfl [vmem:[#allocation1 + $0x10] sm:$0xff pattern:$0x75316420]  ;;  %v150_v34 = vld.sshfl [vmem:[#allocation1 + $0x18] sm:$0xff pattern:$0x75316420]  ;;  %v170_v24 = vadd.f32 %v292_v11, %v169_v20 }
  0x21   :  { %183 = vst [vmem:[#allocation1 + $0x10] ss:$2 sm:$0xff] %v176_v26  ;;  %v161_v35 = vsel %vm155_vm1, %v149_v33, 0.0  ;;  %v162_v36 = vsel %vm155_vm1, %v150_v34, 0.0 }
  0x22   :  { %91 = vadd.xlane.f32.xlu1 %v90_v27  ;;  %159 = vadd.xlane.f32.xlu2 %v158_v32  ;;  %v163_v39 = vadd.f32 %v162_v36, %v161_v35  ;;  %v113_v27 = vld [vmem:[%s443_s2] sm:$0x3]  ;;  %v172_v28 = vsel %vm171_vm6, %v292_v11, %v170_v24  ;;  %s264_s2 = sshll.u32 %s358_s1, 4  ;;  %s265_s2 = int_to_ptr.vmem [resolvable:$true] %s264_s2 }
  0x26   :  { %v180_v37 = vld.sshfl [vmem:[#allocation1] sm:$0xff pattern:$0x75316420]  ;;  %v181_v38 = vld.sshfl [vmem:[#allocation1 + $0x8] sm:$0xff pattern:$0x75316420] }
  0x27   :  { %v190_v40 = vsel %vm155_vm1, %v180_v37, 0.0  ;;  %v191_v41 = vsel %vm155_vm1, %v181_v38, 0.0 }
  0x28   :  { %v192_v42 = vadd.f32 %v191_v41, %v190_v40  ;;  %v184_v43 = vld.sshfl [vmem:[#allocation1 + $0x10] sm:$0xff pattern:$0x75316420]  ;;  %v185_v44 = vld.sshfl [vmem:[#allocation1 + $0x18] sm:$0xff pattern:$0x75316420] }
  0x29   :  { %v195_v45 = vsel %vm155_vm1, %v184_v43, 0.0  ;;  %v196_v46 = vsel %vm155_vm1, %v185_v44, 0.0 }
  0x2a   :  { %193 = vadd.xlane.f32.xlu0 %v192_v42  ;;  %164 = vadd.xlane.f32.xlu2 %v163_v39  ;;  %v197_v47 = vadd.f32 %v196_v46, %v195_v45 }
  0x2c   :  { %198 = vadd.xlane.f32.xlu1 %v197_v47 }
  0x85   :  { %v51_v51 = vpop.xlane.xlu0 %50 }
  0x86   :  { %v57_v59 = vsel %vm46_vm0, %v51_v51, 0.0  ;;  %v121_v51 = vunpack.c.l.s4 %v357_v50 }
  0x88   :  { %v122_v54 = vunpack.c.0.s8 %v121_v51 }
  0x8d   :  { %v87_v55 = vpop.xlane.xlu1 %86  ;;  %v56_v56 = vpop.xlane.xlu0 %55 }
  0x8e   :  { %v58_v58 = vsel %vm46_vm0, %v56_v56, 0.0  ;;  %v93_v2 = vsel %vm46_vm0, %v87_v55, 0.0 }
  0x8f   :  { %v59_v60 = vadd.f32 %v58_v58, %v57_v59 }
  0x91   :  { %v67_v62 = vmul.f32 %v66_v61, %v59_v60 }
  0x93   :  { %v97_v5 = vmul.f32 %v67_v62, %v67_v62 }
  0x95   :  { %v92_v63 = vpop.xlane.xlu1 %91  ;;  %v160_v29 = vpop.xlane.xlu2 %159 }
  0x96   :  { %v94_v3 = vsel %vm46_vm0, %v92_v63, 0.0  ;;  %v173_v32 = vmul.f32 %v172_v28, %v160_v29 }
  0x97   :  { %v95_v4 = vadd.f32 %v94_v3, %v93_v2 }
  0x98   :  { %v202_v34 = vmul.f32 %v173_v32, %v173_v32  ;;  %v213_v56 = vperm.slane %v173_v32, %v122_v54 }
  0x99   :  { %v96_v6 = vmul.f32 %v95_v4, %v66_v61 }
  0x9a   :  { %v220_v60 = vsub.f32 %v399_v13, %v213_v56 }
  0x9b   :  { %v98_v7 = vsub.f32 %v96_v6, %v97_v5 }
  0x9d   :  { %v99_v9 = vmax.f32 %v98_v7, 0.0  ;;  %v194_v33 = vpop.xlane.xlu0 %193  ;;  %v165_v40 = vpop.xlane.xlu2 %164 }
  0x9e   :  { %v200_v35 = vmul.f32 %v194_v33, %v172_v28  ;;  %v174_v42 = vmul.f32 %v172_v28, %v165_v40 }
  0x9f   :  { %v101_v10 = vadd.f32 1e-05, %v99_v9  ;;  %v199_v45 = vpop.xlane.xlu1 %198 }
  0xa0   :  { %v204_v36 = vsub.f32 %v200_v35, %v202_v34  ;;  %v203_v44 = vmul.f32 %v174_v42, %v174_v42  ;;  %v201_v46 = vmul.f32 %v199_v45, %v172_v28  ;;  %v217_v2 = vperm.slane %v174_v42, %v122_v54 }
  0xa1   :  { %293 = vrsqrt.f32 %v101_v10  ;;  %vm108_vm4 = vweird.f32 %v101_v10 }
  0xa2   :  { %v206_v37 = vmax.f32 %v204_v36, 0.0  ;;  %v205_v48 = vsub.f32 %v201_v46, %v203_v44  ;;  %v221_v6 = vsub.f32 %v401_v14, %v217_v2 }
  0xa4   :  { %v222_v38 = vadd.f32 1e-05, %v206_v37  ;;  %v207_v49 = vmax.f32 %v205_v48, 0.0 }
  0xa6   :  { %295 = vrsqrt.f32 %v222_v38  ;;  %v223_v53 = vadd.f32 1e-05, %v207_v49  ;;  %vm230_vm7 = vweird.f32 %v222_v38 }
  0xa7   :  { %v294_v15 = vpop.eup %293 }
  0xa8   :  { %v103_v16 = vmul.f32 %v294_v15, %v101_v10  ;;  %vm109_vm3 = vweird.f32 %v294_v15  ;;  %297 = vrsqrt.f32 %v223_v53  ;;  %vm240_vm10 = vweird.f32 %v223_v53 }
  0xa9   :  { %vm110_vm5 = vmor %vm108_vm4, %vm109_vm3 }
  0xaa   :  { %v104_v18 = vmul.f32 %v294_v15, %v103_v16 }
  0xac   :  { %v105_v19 = vmul.f32 0.5, %v104_v18  ;;  %v296_v39 = vpop.eup %295 }
  0xad   :  { %v225_v41 = vmul.f32 %v296_v39, %v222_v38  ;;  %vm231_vm8 = vweird.f32 %v296_v39 }
  0xae   :  { %v106_v21 = vsub.f32 1.5, %v105_v19  ;;  %vm232_vm9 = vmor %vm230_vm7, %vm231_vm8  ;;  %v298_v57 = vpop.eup %297 }
  0xaf   :  { %v226_v43 = vmul.f32 %v296_v39, %v225_v41  ;;  %v235_v59 = vmul.f32 %v298_v57, %v223_v53  ;;  %vm241_vm11 = vweird.f32 %v298_v57 }
  0xb0   :  { %v107_v23 = vmul.f32 %v294_v15, %v106_v21  ;;  %vm242_vm12 = vmor %vm240_vm10, %vm241_vm11 }
  0xb1   :  { %v227_v47 = vmul.f32 0.5, %v226_v43 }
  0xb2   :  { %v111_v25 = vsel %vm110_vm5, %v294_v15, %v107_v23 }
  0xb3   :  { %v112_v26 = vmul.f32 %v111_v25, %v100_v22  ;;  %v228_v52 = vsub.f32 1.5, %v227_v47 }
  0xb5   :  { %118 = vperm.xlu2 %287, %v112_v26   ;;  %v114_v30 = vmul.f32 %v112_v26, %v67_v62  ;;  %v229_v55 = vmul.f32 %v296_v39, %v228_v52  ;;  %v236_v62 = vmul.f32 %v298_v57, %v235_v59 }
  0xb7   :  { %v115_v31 = vsub.f32 %v113_v27, %v114_v30  ;;  %v233_v58 = vsel %vm232_vm9, %v296_v39, %v229_v55  ;;  %v237_v63 = vmul.f32 0.5, %v236_v62 }
  0xb8   :  { %v249_v61 = vperm.slane %v233_v58, %v122_v54 }
  0xb9   :  { %129 = vperm.xlu0 %288, %v115_v31   ;;  %v238_v3 = vsub.f32 1.5, %v237_v63 }
  0xba   :  { %v256_v4 = vmul.f32 %v249_v61, %v220_v60 }
  0xbb   :  { %v239_v5 = vmul.f32 %v298_v57, %v238_v3 }
  0xbc   :  { %258 = vst [vmem:[#allocation5] sm:$0xcc] %v256_v4 }
  0xbd   :  { %v243_v7 = vsel %vm242_vm12, %v298_v57, %v239_v5 }
  0xbe   :  { %v253_v8 = vperm.slane %v243_v7, %v122_v54 }
  0xc0   :  { %v257_v9 = vmul.f32 %v253_v8, %v221_v6 }
  0xc2   :  { %259 = vst [vmem:[#allocation5 + $0x8] sm:$0xcc] %v257_v9 }
 0x10f   :  { %v119_v10 = vpop.permute.xlu2 %118 }
 0x110   :  { %v123_v11 = vperm.slane %v119_v10, %v122_v54 }
 0x112   :  { %v125_v12 = vmul.f32 %v123_v11, %v385_v0  ;;  %v126_v15 = vmul.f32 %v123_v11, %v387_v1 }
 0x12b   :  { %v130_v13 = vpop.permute.xlu0 %129 }
 0x12c   :  { %v134_v16 = vperm.slane %v130_v13, %v122_v54 }
 0x12e   :  { %v136_v17 = vadd.f32 %v134_v16, %v125_v12  ;;  %v137_v14 = vadd.f32 %v134_v16, %v126_v15 }
 0x130   :  { %138 = vst [vmem:[#allocation5] sm:$0x33] %v136_v17 }
 0x131   :  { %139 = vst [vmem:[#allocation5 + $0x8] sm:$0x33] %v137_v14 }
 0x132   :  { %272 = dma.vmem_to_hbm [thread:$0]  %s265_s2, 256, %s267_s24, [#allocation4], %s352_s17, %s352_s17, %s353_s18  }
 0x133   :  { %349 = dma.done.wait [#allocation4], 256  }
 0x134   :  { %350 = vsyncadd [#allocation4], 4294967040 }
 0x135   :  { %277 = vsyncpa [#allocation3], 1 }
 0x136   :  { %278 = vsyncpa [#allocation4], 1 }

</bundles_post_ra>
